<compile_context>
chip_gen: v6e
topology: v6e:2x2x1
jax: 0.10.0
libtpu: 0.0.40
codegen_flags: <defaults>
</compile_context>

<pallas_src>
import functools

import jax
import jax.numpy as jnp
import numpy as np
from jax import lax
from jax.experimental import pallas as pl
from jax.experimental.pallas import tpu as pltpu


# ----------------------------- Pallas kernel --------------------------------
def _conv_bn_kernel(*refs, rows, taps, relu, res_mode):
    """One (image, row-block) tile of:
         3x3 conv (len(taps) MXU matmuls, K = 3*Cin) + folded-BN bias
         [+ identity residual | + fused 1x1-conv(+BN) shortcut] [+ ReLU].
    The image is VMEM-resident as a flat (rows, 3*Cin) slab per row-phase, so every
    matmul operand is a contiguous row-range slice (no reshapes / relayouts)."""
    if res_mode == "proj":
        x_ref, w_ref, b_ref, r_ref, ws_ref, o_ref = refs
    elif res_mode == "add":
        x_ref, w_ref, b_ref, r_ref, o_ref = refs
    else:
        x_ref, w_ref, b_ref, o_ref = refs

    i = pl.program_id(1)
    r0 = pl.multiple_of(i * rows, 8)            # rows % 16 == 0 by construction

    acc = None
    for t, (phase, off) in enumerate(taps):     # static python loop: 3 ky taps
        lhs = x_ref[0, phase, pl.ds(r0 + off, rows), :]          # (rows, 3*Cin) bf16
        part = jnp.dot(lhs, w_ref[t], preferred_element_type=jnp.float32)
        acc = part if acc is None else acc + part

    acc = acc + b_ref[...]                      # folded BN bias(es), f32 (1, Cout)

    if res_mode == "proj":                      # fused 1x1-conv shortcut (BN folded)
        acc = acc + jnp.dot(r_ref[0], ws_ref[...], preferred_element_type=jnp.float32)
    elif res_mode == "add":                     # identity shortcut
        acc = acc + r_ref[0].astype(jnp.float32)

    if relu:
        acc = jnp.maximum(acc, 0.0)

    o_ref[...] = acc.astype(o_ref.dtype)[None]


# ------------------------------ JAX glue -------------------------------------
def _round_up(x, m):
    return ((x + m - 1) // m) * m


def _nbytes(a):
    return int(np.prod(a.shape)) * np.dtype(a.dtype).itemsize


def _shape_bytes(shape, dtype):
    return int(np.prod(shape)) * np.dtype(dtype).itemsize


def _unfold_kx(x, *, stride, pad=1, ksize=3):
    """Pad NHWC input, split H into row phases, and unfold the kx taps into the
    channel dim so each conv row (ky) becomes ONE (rows, 3*C) @ (3*C, Cout) matmul.
    Returns xK of shape (N, stride, Hph*Wo, 3*C) with rows flattened as h*Wo + w,
    plus (Ho, Wo, ext) where ext = extra rows per phase needed by the ky taps."""
    N, H, W, C = x.shape
    Ho = (H + 2 * pad - ksize) // stride + 1
    Wo = (W + 2 * pad - ksize) // stride + 1
    ext = (ksize - 1) // stride
    Hph = Ho + ext
    hp = stride * Hph                                   # padded H rows (all phases)
    wp = max(W + 2 * pad, (Wo - 1) * stride + ksize)    # padded W cols
    xp = jnp.pad(x, ((0, 0), (pad, hp - H - pad), (pad, wp - W - pad), (0, 0)))
    # row-phase split: xph[n, pr, h] = xp[n, h*stride + pr]
    xph = xp.reshape(N, Hph, stride, wp, C).transpose(0, 2, 1, 3, 4)
    # kx unfold: channel block kx holds column w*stride + kx
    cols = (Wo - 1) * stride + 1
    xk = jnp.concatenate(
        [xph[:, :, :, kx:kx + cols:stride, :] for kx in range(ksize)], axis=-1)
    return xk.reshape(N, stride, Hph * Wo, ksize * C), Ho, Wo, ext


def _pick_rows(total_rows, target):
    """Row-tile R (matmul M dim): multiple of 16 near `target`; prefer a divisor of
    total_rows, else accept a padded partial last block."""
    if total_rows <= target:
        return _round_up(total_rows, 16)
    best = target
    for r in range(target, max(target // 2, 16), -16):
        if total_rows % r == 0:
            best = r
            break
    return _round_up(best, 16)


def _pick_vmem_limit(need_bytes):
    """Derive vmem_limit_bytes from the actual buffer footprint and chip capacity."""
    cap = 128 << 20
    try:
        cap = int(pltpu.get_tpu_info().vmem_capacity_bytes)   # 64 MiB/TC on v7x
    except Exception:
        pass
    hi = min(100 << 20, int(0.85 * cap))
    want = int(1.3 * need_bytes) + (4 << 20)
    if want > hi:
        return want
    return max(32 << 20, want)


def _fold_bn(gamma, beta, mean, var, eps=1e-5):
    scale = gamma / jnp.sqrt(var + eps)
    bias = beta - mean * scale
    return jnp.stack([scale, bias], axis=0)               # (2, Cout)


def _conv3x3_bn(x_nhwc, w_oihw, sb, *, stride, relu, residual=None,
                res_w=None, res_sb=None, out_dtype=jnp.bfloat16, target_rows=None):
    """Fused conv3x3(stride) + folded BN [+ identity residual / fused 1x1 shortcut]
    [+ ReLU] as a single pallas_call over grid (N, row-blocks)."""
    N, H, W, Cin = x_nhwc.shape
    Cout = w_oihw.shape[0]
    Kc = 3 * Cin

    xK, Ho, Wo, ext = _unfold_kx(x_nhwc.astype(jnp.bfloat16), stride=stride)
    total = Ho * Wo

    if target_rows is None:
        # ~512-2048 rows, scaled down for big Cout so the f32 acc stays ~<= 2 MiB
        target_rows = min(2048, max(512, (2 << 20) // (4 * max(Cout, 8))))
    R = _pick_rows(total, target_rows)
    nblk = -(-total // R)
    rows_out = nblk * R
    rows_in = rows_out + ext * Wo
    if rows_in > xK.shape[2]:                              # slack for padded last block
        xK = jnp.pad(xK, ((0, 0), (0, 0), (0, rows_in - xK.shape[2]), (0, 0)))

    if residual is None:
        res_mode = "none"
    elif res_w is None:
        res_mode = "add"
    else:
        res_mode = "proj"

    # Fold BN scale into the conv weights in f32, THEN cast to bf16.
    scale, bias = sb[0].astype(jnp.float32), sb[1].astype(jnp.float32)
    w = jnp.transpose(w_oihw, (2, 3, 1, 0)).astype(jnp.float32) * scale   # (3,3,Cin,Cout)
    w = w.reshape(3, Kc, Cout).astype(jnp.bfloat16)
    if res_mode == "proj":
        res_scale, res_bias = res_sb[0].astype(jnp.float32), res_sb[1].astype(jnp.float32)
        bias = bias + res_bias                              # single fused bias add
        ws = (jnp.transpose(res_w[:, :, 0, 0]).astype(jnp.float32) * res_scale
              ).astype(jnp.bfloat16)                        # (Cres, Cout)
    bias2d = bias.reshape(1, Cout)

    taps = tuple((ky % stride, (ky // stride) * Wo) for ky in range(3))

    in_specs = [
        # whole kx-unfolded image resident in VMEM; re-used across row blocks
        pl.BlockSpec((1, stride, rows_in, Kc), lambda n, i: (n, 0, 0, 0)),
        pl.BlockSpec((3, Kc, Cout), lambda n, i: (0, 0, 0)),
        pl.BlockSpec((1, Cout), lambda n, i: (0, 0)),
    ]
    args = [xK, w, bias2d]
    flops = 2 * N * Ho * Wo * 9 * Cin * Cout

    if res_mode != "none":
        Cres = residual.shape[-1]
        r = residual.astype(jnp.bfloat16).reshape(N, total, Cres)
        if rows_out > total:
            r = jnp.pad(r, ((0, 0), (0, rows_out - total), (0, 0)))
        in_specs.append(pl.BlockSpec((1, R, Cres), lambda n, i: (n, i, 0)))
        args.append(r)
    if res_mode == "proj":
        in_specs.append(pl.BlockSpec(ws.shape, lambda n, i: (0, 0)))
        args.append(ws)
        flops += 2 * N * Ho * Wo * ws.shape[0] * Cout

    # VMEM footprint (double-buffered blocks + f32 temporaries) -> limit
    vmem_need = (2 * _shape_bytes((1, stride, rows_in, Kc), jnp.bfloat16)
                 + 2 * _shape_bytes(w.shape, jnp.bfloat16)
                 + 2 * _shape_bytes((1, Cout), jnp.float32)
                 + 2 * _shape_bytes((1, R, Cout), out_dtype)
                 + 8 * R * Cout * 4 + (2 << 20))
    if res_mode != "none":
        vmem_need += 2 * _shape_bytes((1, R, args[3].shape[-1]), jnp.bfloat16)
    if res_mode == "proj":
        vmem_need += 2 * _shape_bytes(ws.shape, jnp.bfloat16)

    bytes_accessed = (sum(_nbytes(a) for a in args)
                      + N * rows_out * Cout * np.dtype(out_dtype).itemsize)

    kernel = functools.partial(_conv_bn_kernel, rows=R, taps=taps,
                               relu=relu, res_mode=res_mode)

    out = pl.pallas_call(
        kernel,
        out_shape=jax.ShapeDtypeStruct((N, rows_out, Cout), out_dtype),
        grid=(N, nblk),
        in_specs=in_specs,
        out_specs=pl.BlockSpec((1, R, Cout), lambda n, i: (n, i, 0)),
        compiler_params=pltpu.CompilerParams(
            dimension_semantics=("parallel", "parallel"),
            vmem_limit_bytes=_pick_vmem_limit(vmem_need)),
        cost_estimate=pl.CostEstimate(flops=flops, transcendentals=0,
                                      bytes_accessed=bytes_accessed),
    )(*args)

    return out[:, :total, :].reshape(N, Ho, Wo, Cout)


def residual_block(x_nchw, params, *, stride, target_rows=None):
    """Pallas implementation of ResidualBlock.forward (NCHW in / NCHW out)."""
    out_dtype = x_nchw.dtype
    x = jnp.transpose(x_nchw, (0, 2, 3, 1)).astype(jnp.bfloat16)   # -> NHWC bf16
    cin = x.shape[-1]
    cout = params["w1"].shape[0]

    # left branch: conv3x3(stride) + BN + ReLU
    y1 = _conv3x3_bn(x, params["w1"], params["sb1"], stride=stride, relu=True,
                     out_dtype=jnp.bfloat16, target_rows=target_rows)

    if stride != 1 or cin != cout:
        # projection shortcut (1x1 conv + BN) fused into the second conv's kernel
        Ho, Wo = y1.shape[1], y1.shape[2]
        x_ds = x[:, ::stride, ::stride, :][:, :Ho, :Wo, :]
        out = _conv3x3_bn(y1, params["w2"], params["sb2"], stride=1, relu=True,
                          residual=x_ds, res_w=params["ws"], res_sb=params["sbs"],
                          out_dtype=out_dtype, target_rows=target_rows)
    else:
        # identity shortcut fused into the second conv's kernel
        out = _conv3x3_bn(y1, params["w2"], params["sb2"], stride=1, relu=True,
                          residual=x, out_dtype=out_dtype, target_rows=target_rows)
    return jnp.transpose(out, (0, 3, 1, 2))                        # -> NCHW


# --------------------------- pure-JAX reference -------------------------------
def _ref_block(x_nchw, params, *, stride):
    """Reference with the same quantization strategy (BN scale folded into the
    weights in f32, bf16 operands, f32 accumulation)."""
    x = jnp.transpose(x_nchw, (0, 2, 3, 1)).astype(jnp.bfloat16)
    cin = x.shape[-1]
    cout = params["w1"].shape[0]

    def conv_bn(inp, w_oihw, sb, s, pad):
        w = (jnp.transpose(w_oihw, (2, 3, 1, 0)).astype(jnp.float32)
             * sb[0].astype(jnp.float32)).astype(jnp.bfloat16)
        y = lax.conv_general_dilated(
            inp, w, (s, s), [(pad, pad), (pad, pad)],
            dimension_numbers=("NHWC", "HWIO", "NHWC"),
            preferred_element_type=jnp.float32)
        return y + sb[1].astype(jnp.float32)

    y1 = jnp.maximum(conv_bn(x, params["w1"], params["sb1"], stride, 1), 0.0)
    y1 = y1.astype(jnp.bfloat16)
    y2 = conv_bn(y1, params["w2"], params["sb2"], 1, 1)
    if stride != 1 or cin != cout:
        sc = conv_bn(x, params["ws"], params["sbs"], stride, 0)
    else:
        sc = x.astype(jnp.float32)
    out = jnp.maximum(y2 + sc, 0.0)
    return jnp.transpose(out, (0, 3, 1, 2)).astype(x_nchw.dtype)


# --------------------------------- main ---------------------------------------
def _init_params(key, cin, cout, stride):
    ks = jax.random.split(key, 16)

    def bn_params(k):
        k1, k2, k3, k4 = jax.random.split(k, 4)
        gamma = jax.random.uniform(k1, (cout,), jnp.float32, 0.5, 1.5)
        beta = 0.1 * jax.random.normal(k2, (cout,), jnp.float32)
        mean = 0.1 * jax.random.normal(k3, (cout,), jnp.float32)
        var = jax.random.uniform(k4, (cout,), jnp.float32, 0.5, 1.5)
        return _fold_bn(gamma, beta, mean, var)

    params = {
        "w1": 0.2 * jax.random.normal(ks[0], (cout, cin, 3, 3), jnp.float32),
        "sb1": bn_params(ks[1]),
        "w2": 0.2 * jax.random.normal(ks[2], (cout, cout, 3, 3), jnp.float32),
        "sb2": bn_params(ks[3]),
    }
    if stride != 1 or cin != cout:
        params["ws"] = 0.2 * jax.random.normal(ks[4], (cout, cin, 1, 1), jnp.float32)
        params["sbs"] = bn_params(ks[5])
    return params


if __name__ == "__main__":
    key = jax.random.PRNGKey(0)
    k1, k2, k3, k4, k5 = jax.random.split(key, 5)
    run = jax.jit(residual_block, static_argnames=("stride", "target_rows"))

    # case 1: downsampling block (stride 2, channel expansion -> fused 1x1 shortcut)
    N, CIN, COUT, H, W, STRIDE = 2, 4, 8, 16, 16, 2
    x = jax.random.normal(k1, (N, CIN, H, W), jnp.float32)
    params = _init_params(k2, CIN, COUT, STRIDE)
    out = jax.block_until_ready(run(x, params, stride=STRIDE))
    ref = jax.block_until_ready(_ref_block(x, params, stride=STRIDE))
    assert out.shape == (N, COUT, H // STRIDE, W // STRIDE), out.shape
    np.testing.assert_allclose(np.asarray(out), np.asarray(ref), rtol=1e-2, atol=1e-2)

    # case 2: identity-shortcut block (stride 1, cin == cout)
    x2 = jax.random.normal(k3, (N, COUT, H, W), jnp.float32)
    params2 = _init_params(k4, COUT, COUT, 1)
    out2 = jax.block_until_ready(run(x2, params2, stride=1))
    ref2 = jax.block_until_ready(_ref_block(x2, params2, stride=1))
    assert out2.shape == (N, COUT, H, W), out2.shape
    np.testing.assert_allclose(np.asarray(out2), np.asarray(ref2), rtol=1e-2, atol=1e-2)

    # case 3: odd spatial size + forced small row tile -> multi-block grid with a
    # padded partial last block and unaligned tap offsets (Wo not a multiple of 8).
    x3 = jax.random.normal(k5, (N, COUT, 10, 10), jnp.float32)
    out3 = jax.block_until_ready(run(x3, params2, stride=1, target_rows=32))
    ref3 = jax.block_until_ready(_ref_block(x3, params2, stride=1))
    np.testing.assert_allclose(np.asarray(out3), np.asarray(ref3), rtol=1e-2, atol=1e-2)

    # case 4: projection-shortcut path with a multi-block row grid.
    out4 = jax.block_until_ready(run(x, params, stride=STRIDE, target_rows=16))
    np.testing.assert_allclose(np.asarray(out4), np.asarray(ref), rtol=1e-2, atol=1e-2)

    print("KERNEL_OK")
</pallas_src>

<mosaic_0001>
module attributes {stable_mosaic.version = 11 : i64} {
  func.func @_conv_bn_kernel(%arg0: i32, %arg1: i32, %arg2: memref<1x2x72x12xbf16, #tpu.memory_space<vmem>>, %arg3: memref<3x12x8xbf16, #tpu.memory_space<vmem>>, %arg4: memref<1x8xf32, #tpu.memory_space<vmem>>, %arg5: memref<1x64x8xbf16, #tpu.memory_space<vmem>>) attributes {dimension_semantics = [#tpu.dimension_semantics<parallel>, #tpu.dimension_semantics<parallel>], iteration_bounds = array<i64: 2, 1>, scalar_prefetch = 0 : i64, scratch_operands = 0 : i64, tpu.core_type = #tpu.core_type<tc>, window_params = [{transform_indices = @transform_0, window_bounds = array<i64: 1, 2, 72, 12>}, {pipeline_mode = #tpu.pipeline_mode<synchronous>, transform_indices = @transform_1, window_bounds = array<i64: 3, 12, 8>}, {pipeline_mode = #tpu.pipeline_mode<synchronous>, transform_indices = @transform_2, window_bounds = array<i64: 1, 8>}, {transform_indices = @transform_3, window_bounds = array<i64: 1, 64, 8>}]} {
    %c64_i32 = arith.constant 64 : i32
    %0 = arith.muli %arg1, %c64_i32 : i32
    %1 = tpu.assume_multiple %0, 8 : i32
    %c0_i32 = arith.constant 0 : i32
    %2 = arith.addi %1, %c0_i32 : i32
    %c0 = arith.constant 0 : index
    %c0_0 = arith.constant 0 : index
    %3 = arith.index_cast %2 : i32 to index
    %c0_1 = arith.constant 0 : index
    %4 = vector.load %arg2[%c0, %c0_0, %3, %c0_1] : memref<1x2x72x12xbf16, #tpu.memory_space<vmem>>, vector<1x1x64x12xbf16>
    %5 = vector.shape_cast %4 : vector<1x1x64x12xbf16> to vector<64x12xbf16>
    %c0_2 = arith.constant 0 : index
    %c0_3 = arith.constant 0 : index
    %c0_4 = arith.constant 0 : index
    %6 = vector.load %arg3[%c0_2, %c0_3, %c0_4] : memref<3x12x8xbf16, #tpu.memory_space<vmem>>, vector<1x12x8xbf16>
    %7 = vector.shape_cast %6 : vector<1x12x8xbf16> to vector<12x8xbf16>
    %cst = arith.constant dense<0.000000e+00> : vector<64x8xf32>
    %8 = tpu.matmul %5, %7, %cst {dimension_numbers = #tpu.dot_dimension_numbers<[1], [0], [0], [1], [0, 0, 1, 1], [], []>} : vector<64x12xbf16>, vector<12x8xbf16>, vector<64x8xf32> -> vector<64x8xf32>
    %c0_i32_5 = arith.constant 0 : i32
    %9 = arith.addi %1, %c0_i32_5 : i32
    %c0_6 = arith.constant 0 : index
    %c1 = arith.constant 1 : index
    %10 = arith.index_cast %9 : i32 to index
    %c0_7 = arith.constant 0 : index
    %11 = vector.load %arg2[%c0_6, %c1, %10, %c0_7] : memref<1x2x72x12xbf16, #tpu.memory_space<vmem>>, vector<1x1x64x12xbf16>
    %12 = vector.shape_cast %11 : vector<1x1x64x12xbf16> to vector<64x12xbf16>
    %c1_8 = arith.constant 1 : index
    %c0_9 = arith.constant 0 : index
    %c0_10 = arith.constant 0 : index
    %13 = vector.load %arg3[%c1_8, %c0_9, %c0_10] : memref<3x12x8xbf16, #tpu.memory_space<vmem>>, vector<1x12x8xbf16>
    %14 = vector.shape_cast %13 : vector<1x12x8xbf16> to vector<12x8xbf16>
    %cst_11 = arith.constant dense<0.000000e+00> : vector<64x8xf32>
    %15 = tpu.matmul %12, %14, %cst_11 {dimension_numbers = #tpu.dot_dimension_numbers<[1], [0], [0], [1], [0, 0, 1, 1], [], []>} : vector<64x12xbf16>, vector<12x8xbf16>, vector<64x8xf32> -> vector<64x8xf32>
    %16 = arith.addf %8, %15 : vector<64x8xf32>
    %c8_i32 = arith.constant 8 : i32
    %17 = arith.addi %1, %c8_i32 : i32
    %c0_12 = arith.constant 0 : index
    %c0_13 = arith.constant 0 : index
    %18 = arith.index_cast %17 : i32 to index
    %c0_14 = arith.constant 0 : index
    %19 = vector.load %arg2[%c0_12, %c0_13, %18, %c0_14] : memref<1x2x72x12xbf16, #tpu.memory_space<vmem>>, vector<1x1x64x12xbf16>
    %20 = vector.shape_cast %19 : vector<1x1x64x12xbf16> to vector<64x12xbf16>
    %c2 = arith.constant 2 : index
    %c0_15 = arith.constant 0 : index
    %c0_16 = arith.constant 0 : index
    %21 = vector.load %arg3[%c2, %c0_15, %c0_16] : memref<3x12x8xbf16, #tpu.memory_space<vmem>>, vector<1x12x8xbf16>
    %22 = vector.shape_cast %21 : vector<1x12x8xbf16> to vector<12x8xbf16>
    %cst_17 = arith.constant dense<0.000000e+00> : vector<64x8xf32>
    %23 = tpu.matmul %20, %22, %cst_17 {dimension_numbers = #tpu.dot_dimension_numbers<[1], [0], [0], [1], [0, 0, 1, 1], [], []>} : vector<64x12xbf16>, vector<12x8xbf16>, vector<64x8xf32> -> vector<64x8xf32>
    %24 = arith.addf %16, %23 : vector<64x8xf32>
    %c0_18 = arith.constant 0 : index
    %c0_19 = arith.constant 0 : index
    %25 = vector.load %arg4[%c0_18, %c0_19] : memref<1x8xf32, #tpu.memory_space<vmem>>, vector<1x8xf32>
    %26 = vector.broadcast %25 : vector<1x8xf32> to vector<64x8xf32>
    %27 = arith.addf %24, %26 : vector<64x8xf32>
    %cst_20 = arith.constant 0.000000e+00 : f32
    %28 = vector.broadcast %cst_20 : f32 to vector<64x8xf32>
    %29 = arith.maximumf %27, %28 : vector<64x8xf32>
    %30 = arith.truncf %29 : vector<64x8xf32> to vector<64x8xbf16>
    %31 = vector.shape_cast %30 : vector<64x8xbf16> to vector<1x64x8xbf16>
    %c0_21 = arith.constant 0 : index
    %c0_22 = arith.constant 0 : index
    %c0_23 = arith.constant 0 : index
    %32 = vector.load %arg5[%c0_21, %c0_22, %c0_23] : memref<1x64x8xbf16, #tpu.memory_space<vmem>>, vector<1x64x8xbf16>
    tpu.vector_store %arg5[%c0_21, %c0_22, %c0_23], %31 {strides = array<i32>} : memref<1x64x8xbf16, #tpu.memory_space<vmem>>, vector<1x64x8xbf16>,
    return
  }
  func.func @transform_0(%arg0: i32, %arg1: i32) -> (i32, i32, i32, i32) {
    %c0_i32 = arith.constant 0 : i32
    %c0_i32_0 = arith.constant 0 : i32
    %c0_i32_1 = arith.constant 0 : i32
    %c0_i32_2 = arith.constant 0 : i32
    return %arg0, %c0_i32, %c0_i32_0, %c0_i32_1 : i32, i32, i32, i32
  }
  func.func @transform_1(%arg0: i32, %arg1: i32) -> (i32, i32, i32) {
    %c0_i32 = arith.constant 0 : i32
    %c0_i32_0 = arith.constant 0 : i32
    %c0_i32_1 = arith.constant 0 : i32
    %c0_i32_2 = arith.constant 0 : i32
    return %c0_i32, %c0_i32_0, %c0_i32_1 : i32, i32, i32
  }
  func.func @transform_2(%arg0: i32, %arg1: i32) -> (i32, i32) {
    %c0_i32 = arith.constant 0 : i32
    %c0_i32_0 = arith.constant 0 : i32
    %c0_i32_1 = arith.constant 0 : i32
    return %c0_i32, %c0_i32_0 : i32, i32
  }
  func.func @transform_3(%arg0: i32, %arg1: i32) -> (i32, i32, i32) {
    %c0_i32 = arith.constant 0 : i32
    %c0_i32_0 = arith.constant 0 : i32
    return %arg0, %arg1, %c0_i32 : i32, i32, i32
  }
}

module attributes {stable_mosaic.version = 11 : i64} {
  func.func @_conv_bn_kernel(%arg0: i32, %arg1: i32, %arg2: memref<1x1x80x24xbf16, #tpu.memory_space<vmem>>, %arg3: memref<3x24x8xbf16, #tpu.memory_space<vmem>>, %arg4: memref<1x8xf32, #tpu.memory_space<vmem>>, %arg5: memref<1x64x4xbf16, #tpu.memory_space<vmem>>, %arg6: memref<4x8xbf16, #tpu.memory_space<vmem>>, %arg7: memref<1x64x8xf32, #tpu.memory_space<vmem>>) attributes {dimension_semantics = [#tpu.dimension_semantics<parallel>, #tpu.dimension_semantics<parallel>], iteration_bounds = array<i64: 2, 1>, scalar_prefetch = 0 : i64, scratch_operands = 0 : i64, tpu.core_type = #tpu.core_type<tc>, window_params = [{transform_indices = @transform_0, window_bounds = array<i64: 1, 1, 80, 24>}, {pipeline_mode = #tpu.pipeline_mode<synchronous>, transform_indices = @transform_1, window_bounds = array<i64: 3, 24, 8>}, {pipeline_mode = #tpu.pipeline_mode<synchronous>, transform_indices = @transform_2, window_bounds = array<i64: 1, 8>}, {transform_indices = @transform_3, window_bounds = array<i64: 1, 64, 4>}, {pipeline_mode = #tpu.pipeline_mode<synchronous>, transform_indices = @transform_4, window_bounds = array<i64: 4, 8>}, {transform_indices = @transform_5, window_bounds = array<i64: 1, 64, 8>}]} {
    %c64_i32 = arith.constant 64 : i32
    %0 = arith.muli %arg1, %c64_i32 : i32
    %1 = tpu.assume_multiple %0, 8 : i32
    %c0_i32 = arith.constant 0 : i32
    %2 = arith.addi %1, %c0_i32 : i32
    %c0 = arith.constant 0 : index
    %c0_0 = arith.constant 0 : index
    %3 = arith.index_cast %2 : i32 to index
    %c0_1 = arith.constant 0 : index
    %4 = vector.load %arg2[%c0, %c0_0, %3, %c0_1] : memref<1x1x80x24xbf16, #tpu.memory_space<vmem>>, vector<1x1x64x24xbf16>
    %5 = vector.shape_cast %4 : vector<1x1x64x24xbf16> to vector<64x24xbf16>
    %c0_2 = arith.constant 0 : index
    %c0_3 = arith.constant 0 : index
    %c0_4 = arith.constant 0 : index
    %6 = vector.load %arg3[%c0_2, %c0_3, %c0_4] : memref<3x24x8xbf16, #tpu.memory_space<vmem>>, vector<1x24x8xbf16>
    %7 = vector.shape_cast %6 : vector<1x24x8xbf16> to vector<24x8xbf16>
    %cst = arith.constant dense<0.000000e+00> : vector<64x8xf32>
    %8 = tpu.matmul %5, %7, %cst {dimension_numbers = #tpu.dot_dimension_numbers<[1], [0], [0], [1], [0, 0, 1, 1], [], []>} : vector<64x24xbf16>, vector<24x8xbf16>, vector<64x8xf32> -> vector<64x8xf32>
    %c8_i32 = arith.constant 8 : i32
    %9 = arith.addi %1, %c8_i32 : i32
    %c0_5 = arith.constant 0 : index
    %c0_6 = arith.constant 0 : index
    %10 = arith.index_cast %9 : i32 to index
    %c0_7 = arith.constant 0 : index
    %11 = vector.load %arg2[%c0_5, %c0_6, %10, %c0_7] : memref<1x1x80x24xbf16, #tpu.memory_space<vmem>>, vector<1x1x64x24xbf16>
    %12 = vector.shape_cast %11 : vector<1x1x64x24xbf16> to vector<64x24xbf16>
    %c1 = arith.constant 1 : index
    %c0_8 = arith.constant 0 : index
    %c0_9 = arith.constant 0 : index
    %13 = vector.load %arg3[%c1, %c0_8, %c0_9] : memref<3x24x8xbf16, #tpu.memory_space<vmem>>, vector<1x24x8xbf16>
    %14 = vector.shape_cast %13 : vector<1x24x8xbf16> to vector<24x8xbf16>
    %cst_10 = arith.constant dense<0.000000e+00> : vector<64x8xf32>
    %15 = tpu.matmul %12, %14, %cst_10 {dimension_numbers = #tpu.dot_dimension_numbers<[1], [0], [0], [1], [0, 0, 1, 1], [], []>} : vector<64x24xbf16>, vector<24x8xbf16>, vector<64x8xf32> -> vector<64x8xf32>
    %16 = arith.addf %8, %15 : vector<64x8xf32>
    %c16_i32 = arith.constant 16 : i32
    %17 = arith.addi %1, %c16_i32 : i32
    %c0_11 = arith.constant 0 : index
    %c0_12 = arith.constant 0 : index
    %18 = arith.index_cast %17 : i32 to index
    %c0_13 = arith.constant 0 : index
    %19 = vector.load %arg2[%c0_11, %c0_12, %18, %c0_13] : memref<1x1x80x24xbf16, #tpu.memory_space<vmem>>, vector<1x1x64x24xbf16>
    %20 = vector.shape_cast %19 : vector<1x1x64x24xbf16> to vector<64x24xbf16>
    %c2 = arith.constant 2 : index
    %c0_14 = arith.constant 0 : index
    %c0_15 = arith.constant 0 : index
    %21 = vector.load %arg3[%c2, %c0_14, %c0_15] : memref<3x24x8xbf16, #tpu.memory_space<vmem>>, vector<1x24x8xbf16>
    %22 = vector.shape_cast %21 : vector<1x24x8xbf16> to vector<24x8xbf16>
    %cst_16 = arith.constant dense<0.000000e+00> : vector<64x8xf32>
    %23 = tpu.matmul %20, %22, %cst_16 {dimension_numbers = #tpu.dot_dimension_numbers<[1], [0], [0], [1], [0, 0, 1, 1], [], []>} : vector<64x24xbf16>, vector<24x8xbf16>, vector<64x8xf32> -> vector<64x8xf32>
    %24 = arith.addf %16, %23 : vector<64x8xf32>
    %c0_17 = arith.constant 0 : index
    %c0_18 = arith.constant 0 : index
    %25 = vector.load %arg4[%c0_17, %c0_18] : memref<1x8xf32, #tpu.memory_space<vmem>>, vector<1x8xf32>
    %26 = vector.broadcast %25 : vector<1x8xf32> to vector<64x8xf32>
    %27 = arith.addf %24, %26 : vector<64x8xf32>
    %c0_19 = arith.constant 0 : index
    %c0_20 = arith.constant 0 : index
    %c0_21 = arith.constant 0 : index
    %28 = vector.load %arg5[%c0_19, %c0_20, %c0_21] : memref<1x64x4xbf16, #tpu.memory_space<vmem>>, vector<1x64x4xbf16>
    %29 = vector.shape_cast %28 : vector<1x64x4xbf16> to vector<64x4xbf16>
    %c0_22 = arith.constant 0 : index
    %c0_23 = arith.constant 0 : index
    %30 = vector.load %arg6[%c0_22, %c0_23] : memref<4x8xbf16, #tpu.memory_space<vmem>>, vector<4x8xbf16>
    %cst_24 = arith.constant dense<0.000000e+00> : vector<64x8xf32>
    %31 = tpu.matmul %29, %30, %cst_24 {dimension_numbers = #tpu.dot_dimension_numbers<[1], [0], [0], [1], [0, 0, 1, 1], [], []>} : vector<64x4xbf16>, vector<4x8xbf16>, vector<64x8xf32> -> vector<64x8xf32>
    %32 = arith.addf %27, %31 : vector<64x8xf32>
    %cst_25 = arith.constant 0.000000e+00 : f32
    %33 = vector.broadcast %cst_25 : f32 to vector<64x8xf32>
    %34 = arith.maximumf %32, %33 : vector<64x8xf32>
    %35 = vector.shape_cast %34 : vector<64x8xf32> to vector<1x64x8xf32>
    %c0_26 = arith.constant 0 : index
    %c0_27 = arith.constant 0 : index
    %c0_28 = arith.constant 0 : index
    %36 = vector.load %arg7[%c0_26, %c0_27, %c0_28] : memref<1x64x8xf32, #tpu.memory_space<vmem>>, vector<1x64x8xf32>
    tpu.vector_store %arg7[%c0_26, %c0_27, %c0_28], %35 {strides = array<i32>} : memref<1x64x8xf32, #tpu.memory_space<vmem>>, vector<1x64x8xf32>,
    return
  }
  func.func @transform_0(%arg0: i32, %arg1: i32) -> (i32, i32, i32, i32) {
    %c0_i32 = arith.constant 0 : i32
    %c0_i32_0 = arith.constant 0 : i32
    %c0_i32_1 = arith.constant 0 : i32
    %c0_i32_2 = arith.constant 0 : i32
    return %arg0, %c0_i32, %c0_i32_0, %c0_i32_1 : i32, i32, i32, i32
  }
  func.func @transform_1(%arg0: i32, %arg1: i32) -> (i32, i32, i32) {
    %c0_i32 = arith.constant 0 : i32
    %c0_i32_0 = arith.constant 0 : i32
    %c0_i32_1 = arith.constant 0 : i32
    %c0_i32_2 = arith.constant 0 : i32
    return %c0_i32, %c0_i32_0, %c0_i32_1 : i32, i32, i32
  }
  func.func @transform_2(%arg0: i32, %arg1: i32) -> (i32, i32) {
    %c0_i32 = arith.constant 0 : i32
    %c0_i32_0 = arith.constant 0 : i32
    %c0_i32_1 = arith.constant 0 : i32
    return %c0_i32, %c0_i32_0 : i32, i32
  }
  func.func @transform_3(%arg0: i32, %arg1: i32) -> (i32, i32, i32) {
    %c0_i32 = arith.constant 0 : i32
    %c0_i32_0 = arith.constant 0 : i32
    return %arg0, %arg1, %c0_i32 : i32, i32, i32
  }
  func.func @transform_4(%arg0: i32, %arg1: i32) -> (i32, i32) {
    %c0_i32 = arith.constant 0 : i32
    %c0_i32_0 = arith.constant 0 : i32
    %c0_i32_1 = arith.constant 0 : i32
    return %c0_i32, %c0_i32_0 : i32, i32
  }
  func.func @transform_5(%arg0: i32, %arg1: i32) -> (i32, i32, i32) {
    %c0_i32 = arith.constant 0 : i32
    %c0_i32_0 = arith.constant 0 : i32
    return %arg0, %arg1, %c0_i32 : i32, i32, i32
  }
}

</mosaic_0001>

<bundles_post_ra>
// kernel: residual_block.2
= control target key start
LH: loop header
LB: loop body
LE: loop exit
PB: predicated region body
PF: predicated region fallthrough
CT: control target
= control target key end

     0   :  { %s927_s12 = smov 0   ;;  %s929_s13 = smov 0   ;;  %s1013_s0 = inlined_call_operand.vmem [shape: bf16[2,2,72,12], index: 0, kind: input, shape index: {}]   ;;  %s1014_s1 = inlined_call_operand.vmem [shape: bf16[3,12,8], index: 1, kind: input, shape index: {}]   ;;  %s1015_s2 = inlined_call_operand.vmem [shape: f32[1,8], index: 2, kind: input, shape index: {}]   ;;  %s1016_s3 = inlined_call_operand.vmem [shape: bf16[2,64,8], index: 3, kind: output, shape index: {}]  }
   0x1   :  { %s931_s14 = smov 0  }
   0x2 LB: > { %s25_s15 = sadd.s32 1, %s901_s13  ;;  %p721_p0 = scmp.ge.s32.totalorder %s905_s14, 1  ;;  %s905_s14 = sphi %s931_s14, %s13_s14   ;;  %s901_s13 = sphi %s929_s13, %s1018_s13   ;;  %s897_s12 = sphi %s927_s12, %s1017_s12  }
   0x3   : > { %p27_p1 = scmp.ge.s32.totalorder %s25_s15, 2  ;;  %p151_p2 = scmp.lt.s32.totalorder %s905_s14, 3 }
   0x5   : > { %s1020_s15 = smov (%p27_p1, %s25_s15), 0  ;;  %p152_p3 = pnand %p721_p0, %p151_p2 }
   0x6   : > { %p179_p4 = scmp.lt.s32.totalorder (!%p152_p3), %s897_s12, 1 }
   0x7   : > { %155 = sbr.rel (%p152_p3) target bundleno = 244 (0xf4), region = 32 }
   0xc   : > { %v868_v0 = vld [vmem:[%s1014_s1 + $0x8] sm:$0x3f]   ;;  %vm262_vm0 = vcmask 1045504   ;;  %v871_v2 = vld [vmem:[%s1014_s1] sm:$0x3f]   ;;  %s1022_s12 = smov (!%p179_p4, %s897_s12), 1 }
   0xd   : > { %840 = vmatprep.subr.msk.bf16.mxu1 %vm262_vm0, %v868_v0  ;;  %839 = vmatprep.subr.msk.bf16.mxu0 %vm262_vm0, %v868_v0  ;;  %v264_v1 = vsel %vm262_vm0, %v868_v0, 0  ;;  %v874_v3 = vld [vmem:[%s1014_s1 + $0x10] sm:$0x3f]   ;;  %s843_s22 = smul.u32 72, %s1022_s12  ;;  %vm249_vm1 = vcmask 97280   ;;  %v369_v9 = vsel %vm262_vm0, %v871_v2, 0 }
   0xe   : > { %838 = vmatpush3.bf16.msra.mxu1 %v264_v1  ;;  %808 = vmatpush3.bf16.msra.mxu0 %v264_v1  ;;  %v490_v7 = vsel %vm262_vm0, %v874_v3, 0  ;;  %v772_v30 = vld [vmem:[%s1015_s2] ss:$0 sm:$0xff]  ;;  %s783_s28 = sshll.u32 %s1022_s12, 5  ;;  %vm620_vm2 = vcmask 60416  }
   0xf   : > { %841 = vmatprep.subr.msk.bf16.mxu1 %vm262_vm0, %v871_v2  ;;  %842 = vmatprep.subr.msk.bf16.mxu0 %vm262_vm0, %v874_v3  ;;  %s183_s25 = scalar_lea.vmem %s1013_s0, %s843_s22  ;;  %s986_s4 = scalar_lea.vmem %s1016_s3, %s783_s28 }
  0x10   : > { %v869_v4 = vld [vmem:[%s183_s25 + $0x24] sm:$0xff]   ;;  %v870_v5 = vld [vmem:[%s183_s25 + $0x34] sm:$0xff]   ;;  %v872_v6 = vld [vmem:[%s183_s25 + $0x2c] sm:$0xff]  }
  0x11   : > { %809 = vmatprep.mubr.msk.bf16.mxu0 %vm249_vm1, %v869_v4  ;;  %813 = vmatprep.mubr.msk.bf16.mxu1 %vm249_vm1, %v870_v5  ;;  %v873_v8 = vld [vmem:[%s183_s25 + $0x3c] sm:$0xff]   ;;  %v876_v11 = vld [vmem:[%s183_s25 + $0x4] sm:$0xff]   ;;  %v878_v13 = vld [vmem:[%s183_s25 + $0xc] sm:$0xff]  }
  0x12   : > { %810 = vmatmul.mubr.msk.bf16.vlgmr.msra.gmra.mxu0 %vm249_vm1, %v872_v6  ;;  %v875_v10 = vld [vmem:[%s183_s25] sm:$0xff]   ;;  %814 = vmatmul.mubr.msk.bf16.vlgmr.msra.gmra.mxu1 %vm249_vm1, %v873_v8  ;;  %v877_v12 = vld [vmem:[%s183_s25 + $0x8] sm:$0xff]   ;;  %v880_v14 = vld [vmem:[%s183_s25 + $0x14] sm:$0xff]  }
  0x13   : > { %828 = vmatpush3.bf16.msra.mxu0 %v490_v7  ;;  %818 = vmatpush3.bf16.msra.mxu1 %v369_v9  ;;  %v879_v15 = vld [vmem:[%s183_s25 + $0x10] sm:$0xff]   ;;  %v882_v16 = vld [vmem:[%s183_s25 + $0x1c] sm:$0xff]  }
  0x14   : > { %819 = vmatprep.mubr.msk.bf16.mxu1 %vm249_vm1, %v875_v10  ;;  %829 = vmatprep.mubr.msk.bf16.mxu0 %vm249_vm1, %v876_v11  ;;  %v881_v17 = vld [vmem:[%s183_s25 + $0x18] sm:$0xff]  }
  0x1a   : > { %830 = vmatmul.mubr.msk.bf16.vlgmr.msra.gmra.mxu0 %vm249_vm1, %v878_v13  ;;  %820 = vmatmul.mubr.msk.bf16.vlgmr.msra.gmra.mxu1 %vm249_vm1, %v877_v12 }
  0x1b   : > { %833 = vmatprep.mubr.msk.bf16.mxu0 %vm249_vm1, %v880_v14  ;;  %823 = vmatprep.mubr.msk.bf16.mxu1 %vm249_vm1, %v879_v15 }
  0x22   : > { %834 = vmatmul.mubr.msk.bf16.gmra.mxu0 %vm249_vm1, %v882_v16  ;;  %824 = vmatmul.mubr.msk.bf16.gmra.mxu1 %vm249_vm1, %v881_v17 }
  0xd2   : > { %v811_v18 = vpop.f32.mrf.mxu0  ;;  %v815_v19 = vpop.f32.mrf.mxu1 }
  0xd4   : > { %v300_v20 = vpop.f32.mrf.mxu0  ;;  %v316_v21 = vpop.f32.mrf.mxu1 }
  0xd6   : > { %v812_v22 = vpop.f32.mrf.mxu0  ;;  %v816_v23 = vpop.f32.mrf.mxu1 }
  0xd8   : > { %v303_v24 = vpop.f32.mrf.mxu0  ;;  %v319_v25 = vpop.f32.mrf.mxu1 }
  0xda   : > { %v831_v26 = vpop.f32.mrf.mxu0  ;;  %v821_v27 = vpop.f32.mrf.mxu1 }
  0xdb   : > { %v414_v28 = vadd.f32 %v821_v27, %v811_v18 }
  0xdc   : > { %v526_v29 = vpop.f32.mrf.mxu0  ;;  %v405_v31 = vpop.f32.mrf.mxu1 }
  0xdd   : > { %v559_v32 = vadd.f32 %v831_v26, %v414_v28  ;;  %v406_v33 = vadd.f32 %v405_v31, %v300_v20 }
  0xde   : > { %v832_v34 = vpop.f32.mrf.mxu0  ;;  %v822_v35 = vpop.f32.mrf.mxu1 }
  0xdf   : > { %v574_v36 = vadd.f32 %v772_v30, %v559_v32  ;;  %v557_v37 = vadd.f32 %v526_v29, %v406_v33  ;;  %v417_v38 = vadd.f32 %v822_v35, %v812_v22 }
  0xe0   : > { %v529_v39 = vpop.f32.mrf.mxu0  ;;  %v408_v40 = vpop.f32.mrf.mxu1 }
  0xe1   : > { %v582_v41 = vmax.f32 %v574_v36, 0.0  ;;  %v572_v42 = vadd.f32 %v772_v30, %v557_v37  ;;  %v560_v43 = vadd.f32 %v832_v34, %v417_v38  ;;  %v409_v44 = vadd.f32 %v408_v40, %v303_v24 }
  0xe2   : > { %v835_v45 = vpop.f32.mrf.mxu0  ;;  %v825_v46 = vpop.f32.mrf.mxu1 }
  0xe3   : > { %v786_v47 = vpack.c.bf16 %v582_v41, %v582_v41  ;;  %v580_v48 = vmax.f32 %v572_v42, 0.0  ;;  %v575_v49 = vadd.f32 %v772_v30, %v560_v43  ;;  %v558_v50 = vadd.f32 %v529_v39, %v409_v44 }
  0xe4   : > { %v542_v51 = vpop.f32.mrf.mxu0  ;;  %v430_v52 = vadd.f32 %v825_v46, %v815_v19  ;;  %v421_v53 = vpop.f32.mrf.mxu1 }
  0xe5   : > { %623 = vst.msk [vmem:[%s986_s4 + $0x8] sm:$0xf] %vm620_vm2, %v786_v47  ;;  %v784_v54 = vpack.c.bf16 %v580_v48, %v580_v48  ;;  %v583_v55 = vmax.f32 %v575_v49, 0.0  ;;  %v573_v56 = vadd.f32 %v772_v30, %v558_v50  ;;  %v422_v57 = vadd.f32 %v421_v53, %v316_v21 }
  0xe6   : > { %v563_v58 = vadd.f32 %v835_v45, %v430_v52  ;;  %v826_v59 = vpop.f32.mrf.mxu1  ;;  %v836_v60 = vpop.f32.mrf.mxu0 }
  0xe7   : > { %621 = vst.msk [vmem:[%s986_s4] sm:$0xf] %vm620_vm2, %v784_v54  ;;  %v787_v61 = vpack.c.bf16 %v583_v55, %v583_v55  ;;  %v581_v62 = vmax.f32 %v573_v56, 0.0  ;;  %v561_v63 = vadd.f32 %v542_v51, %v422_v57  ;;  %v433_v0 = vadd.f32 %v826_v59, %v816_v23 }
  0xe8   : > { %v578_v1 = vadd.f32 %v772_v30, %v563_v58  ;;  %v424_v2 = vpop.f32.mrf.mxu1  ;;  %v545_v8 = vpop.f32.mrf.mxu0 }
  0xe9   : > { %624 = vst.msk [vmem:[%s986_s4 + $0xc] sm:$0xf] %vm620_vm2, %v787_v61  ;;  %v785_v3 = vpack.c.bf16 %v581_v62, %v581_v62  ;;  %v576_v4 = vadd.f32 %v772_v30, %v561_v63  ;;  %v564_v5 = vadd.f32 %v836_v60, %v433_v0  ;;  %v425_v6 = vadd.f32 %v424_v2, %v319_v25 }
  0xea   : > { %v586_v7 = vmax.f32 %v578_v1, 0.0 }
  0xeb   : > { %622 = vst.msk [vmem:[%s986_s4 + $0x4] sm:$0xf] %vm620_vm2, %v785_v3  ;;  %v584_v9 = vmax.f32 %v576_v4, 0.0  ;;  %v579_v10 = vadd.f32 %v772_v30, %v564_v5  ;;  %v562_v11 = vadd.f32 %v545_v8, %v425_v6 }
  0xec   : > { %v790_v12 = vpack.c.bf16 %v586_v7, %v586_v7 }
  0xed   : > { %v788_v13 = vpack.c.bf16 %v584_v9, %v584_v9  ;;  %v587_v14 = vmax.f32 %v579_v10, 0.0  ;;  %v577_v15 = vadd.f32 %v772_v30, %v562_v11 }
  0xee   : > { %627 = vst.msk [vmem:[%s986_s4 + $0x18] sm:$0xf] %vm620_vm2, %v790_v12 }
  0xef   : > { %625 = vst.msk [vmem:[%s986_s4 + $0x10] sm:$0xf] %vm620_vm2, %v788_v13  ;;  %v791_v16 = vpack.c.bf16 %v587_v14, %v587_v14  ;;  %v585_v17 = vmax.f32 %v577_v15, 0.0 }
  0xf1   : > { %628 = vst.msk [vmem:[%s986_s4 + $0x1c] sm:$0xf] %vm620_vm2, %v791_v16  ;;  %v789_v18 = vpack.c.bf16 %v585_v17, %v585_v17 }
  0xf3   : > { %626 = vst.msk [vmem:[%s986_s4 + $0x14] sm:$0xf] %vm620_vm2, %v789_v18 }
  0xf4 PF: > { %s13_s14 = sadd.s32 1, %s905_s14   ;;  %s1017_s12 = smov %s901_s13 }
  0xf5   : > { %p10_p5 = scmp.ge.s32.totalorder %s13_s14, 4   ;;  %s1018_s13 = smov %s1020_s15 }
  0xf7   :  { %12 = sbr.rel (!%p10_p5) target bundleno = 2 (0x2), region = 67 }

// kernel: residual_block.3
= control target key start
LH: loop header
LB: loop body
LE: loop exit
PB: predicated region body
PF: predicated region fallthrough
CT: control target
= control target key end

     0   :  { %s1177_s18 = smov 0   ;;  %s1179_s19 = smov 0   ;;  %s1304_s0 = inlined_call_operand.vmem [shape: bf16[2,1,80,24], index: 0, kind: input, shape index: {}]   ;;  %s1305_s1 = inlined_call_operand.vmem [shape: bf16[3,24,8], index: 1, kind: input, shape index: {}]   ;;  %s1306_s2 = inlined_call_operand.vmem [shape: f32[1,8], index: 2, kind: input, shape index: {}]   ;;  %s1307_s3 = inlined_call_operand.vmem [shape: bf16[2,64,4], index: 3, kind: input, shape index: {}]   ;;  %s1308_s4 = inlined_call_operand.vmem [shape: bf16[4,8], index: 4, kind: input, shape index: {}]   ;;  %s1309_s5 = inlined_call_operand.vmem [shape: f32[2,64,8], index: 5, kind: output, shape index: {}]  }
   0x1   :  { %s1181_s20 = smov 0  }
   0x2 LB: > { %s27_s21 = sadd.s32 1, %s1141_s19  ;;  %p932_p0 = scmp.ge.s32.totalorder %s1145_s20, 1  ;;  %s1145_s20 = sphi %s1181_s20, %s15_s20   ;;  %s1141_s19 = sphi %s1179_s19, %s1311_s19   ;;  %s1137_s18 = sphi %s1177_s18, %s1310_s18  }
   0x3   : > { %p29_p1 = scmp.ge.s32.totalorder %s27_s21, 2  ;;  %p218_p2 = scmp.lt.s32.totalorder %s1145_s20, 3 }
   0x5   : > { %s1313_s21 = smov (%p29_p1, %s27_s21), 0  ;;  %p219_p3 = pnand %p932_p0, %p218_p2 }
   0x6   : > { %p259_p4 = scmp.lt.s32.totalorder (!%p219_p3), %s1137_s18, 1 }
   0x7   : > { %222 = sbr.rel (%p219_p3) target bundleno = 253 (0xfd), region = 40 }
   0xc   : > { %v1101_v0 = vld [vmem:[%s1305_s1 + $0x14] ss:$0 sps:$4 sm:$0xff]   ;;  %vm360_vm0 = vcmask 1043456   ;;  %v1103_v1 = vld [vmem:[%s1305_s1 + $0xc] sm:$0xff]   ;;  %v1102_v2 = vld [vmem:[%s1305_s1 + $0x8] ss:$0 sps:$4 sm:$0xff]  }
   0xd   : > { %1072 = vmatprep.subr.msk.bf16.mxu0 %vm360_vm0, %v1101_v0  ;;  %v362_v3 = vsel %vm360_vm0, %v1101_v0, 0  ;;  %v1104_v4 = vld [vmem:[%s1305_s1] sm:$0xff]   ;;  %1073 = vmatprep.subr.msk.bf16.mxu1 %vm360_vm0, %v1102_v2  ;;  %v471_v5 = vsel %vm360_vm0, %v1102_v2, 0  ;;  %s1315_s18 = smov (!%p259_p4, %s1137_s18), 1  ;;  %vm729_vm1 = vcmask 1041408   ;;  %vm347_vm2 = vcmask 195584  }
   0xe   : > { %1027 = vmatpush3.bf16.msra.mxu0 %v362_v3  ;;  %1039 = vmatpush3.bf16.msra.mxu1 %v471_v5  ;;  %v1109_v6 = vld [vmem:[%s1305_s1 + $0x20] ss:$0 sps:$4 sm:$0xff]   ;;  %s1076_s9 = smul.u32 40, %s1315_s18  ;;  %s1001_s10 = sshll.u32 %s1315_s18, 5  ;;  %v1114_v10 = vld [vmem:[%s1305_s1 + $0x18] sm:$0xff]   ;;  %vm716_vm3 = vcmask 31744  }
   0xf   : > { %1028 = vmatprep.subr.bf16.mxu0 %v1103_v1  ;;  %1040 = vmatprep.subr.bf16.mxu1 %v1104_v4  ;;  %v695_v7 = vld [vmem:[%s1308_s4] sm:$0x3]  ;;  %s1225_s13 = scalar_lea.vmem %s1307_s3, %s1001_s10  ;;  %v597_v12 = vsel %vm360_vm0, %v1109_v6, 0  ;;  %s1002_s25 = sshll.u32 %s1315_s18, 6  ;;  %vm814_vm4 = vcmask 64512  }
  0x10   : > { %s1230_s16 = scalar_lea.vmem %s1304_s0, %s1076_s9  ;;  %v731_v14 = vsel %vm729_vm1, %v695_v7, 0  ;;  %v1116_v20 = vld [vmem:[%s1225_s13] sm:$0xff]   ;;  %v1118_v22 = vld [vmem:[%s1225_s13 + $0x8] sm:$0xff]   ;;  %v1120_v24 = vld [vmem:[%s1225_s13 + $0x10] sm:$0xff]   ;;  %s1277_s28 = scalar_lea.vmem %s1309_s5, %s1002_s25 }
  0x11   : > { %v1105_v8 = vld [vmem:[%s1230_s16 + $0x4] sm:$0xff]   ;;  %v1107_v11 = vld [vmem:[%s1230_s16 + $0xc] sm:$0xff]   ;;  %v1110_v15 = vld [vmem:[%s1230_s16 + $0x14] sm:$0xff]  }
  0x12   : > { %1029 = vmatpush3.bf16.msra.mxu0 %v1103_v1  ;;  %1041 = vmatpush3.bf16.msra.mxu1 %v1104_v4  ;;  %v1106_v9 = vld [vmem:[%s1230_s16] sm:$0xff]   ;;  %v1108_v13 = vld [vmem:[%s1230_s16 + $0x8] sm:$0xff]   ;;  %v1111_v16 = vld [vmem:[%s1230_s16 + $0x10] sm:$0xff]  }
  0x13   : > { %1074 = vmatprep.subr.msk.bf16.mxu0 %vm360_vm0, %v1109_v6  ;;  %1075 = vmatprep.subr.msk.bf16.mxu1 %vm729_vm1, %v695_v7  ;;  %v1112_v17 = vld [vmem:[%s1230_s16 + $0x1c] sm:$0xff]   ;;  %v1115_v19 = vld [vmem:[%s1230_s16 + $0x8] sm:$0xff]   ;;  %v1117_v21 = vld [vmem:[%s1230_s16 + $0x10] sm:$0xff]  }
  0x14   : > { %1030 = vmatprep.mubr.msk.bf16.mxu0 %vm347_vm2, %v1105_v8  ;;  %1042 = vmatprep.mubr.msk.bf16.mxu1 %vm347_vm2, %v1106_v9  ;;  %v1113_v18 = vld [vmem:[%s1230_s16 + $0x18] sm:$0xff]   ;;  %v1121_v25 = vld [vmem:[%s1230_s16 + $0x20] sm:$0xff]  }
  0x15   : > { %1031 = vmatmul.mubr.msk.bf16.vlgmr.msra.gmra.mxu0 %vm347_vm2, %v1107_v11  ;;  %1043 = vmatmul.mubr.msk.bf16.vlgmr.msra.gmra.mxu1 %vm347_vm2, %v1108_v13  ;;  %v1119_v23 = vld [vmem:[%s1230_s16 + $0x18] sm:$0xff]   ;;  %v990_v45 = vld [vmem:[%s1306_s2] ss:$0 sm:$0xff] }
  0x16   : > { %1051 = vmatpush3.bf16.msra.mxu0 %v597_v12  ;;  %1063 = vmatpush3.bf16.msra.mxu1 %v731_v14  ;;  %v1122_v26 = vld [vmem:[%s1225_s13 + $0x18] sm:$0xff]  }
  0x17   : > { %1034 = vmatprep.mubr.msk.bf16.mxu0 %vm347_vm2, %v1110_v15  ;;  %1046 = vmatprep.mubr.msk.bf16.mxu1 %vm347_vm2, %v1111_v16 }
  0x18   : > { %1052 = vmatprep.subr.bf16.mxu0 %v1114_v10 }
  0x1a   : > { %1053 = vmatpush3.bf16.msra.mxu0 %v1114_v10 }
  0x1d   : > { %1035 = vmatmul.mubr.msk.bf16.gmra.mxu0 %vm347_vm2, %v1112_v17  ;;  %1047 = vmatmul.mubr.msk.bf16.gmra.mxu1 %vm347_vm2, %v1113_v18 }
  0x1e   : > { %1054 = vmatprep.mubr.msk.bf16.mxu0 %vm347_vm2, %v1115_v19  ;;  %1064 = vmatprep.mubr.msk.bf16.mxu1 %vm716_vm3, %v1116_v20 }
  0x25   : > { %1055 = vmatmul.mubr.msk.bf16.vlgmr.msra.gmra.mxu0 %vm347_vm2, %v1117_v21  ;;  %1065 = vmatmul.mubr.msk.bf16.vlgmr.msra.gmra.mxu1 %vm716_vm3, %v1118_v22 }
  0x26   : > { %1058 = vmatprep.mubr.msk.bf16.mxu0 %vm347_vm2, %v1119_v23  ;;  %1068 = vmatprep.mubr.msk.bf16.mxu1 %vm716_vm3, %v1120_v24 }
  0x2d   : > { %1059 = vmatmul.mubr.msk.bf16.gmra.mxu0 %vm347_vm2, %v1121_v25  ;;  %1069 = vmatmul.mubr.msk.bf16.gmra.mxu1 %vm716_vm3, %v1122_v26 }
  0xd5   : > { %v1032_v27 = vpop.f32.mrf.mxu0  ;;  %v1044_v28 = vpop.f32.mrf.mxu1 }
  0xd6   : > { %v516_v42 = vadd.f32 %v1044_v28, %v1032_v27 }
  0xd7   : > { %v398_v29 = vpop.f32.mrf.mxu0  ;;  %v507_v30 = vpop.f32.mrf.mxu1 }
  0xd8   : > { %v508_v46 = vadd.f32 %v507_v30, %v398_v29 }
  0xd9   : > { %v1033_v31 = vpop.f32.mrf.mxu0  ;;  %v1045_v32 = vpop.f32.mrf.mxu1 }
  0xda   : > { %v519_v50 = vadd.f32 %v1045_v32, %v1033_v31 }
  0xdb   : > { %v401_v33 = vpop.f32.mrf.mxu0  ;;  %v510_v34 = vpop.f32.mrf.mxu1 }
  0xdc   : > { %v511_v55 = vadd.f32 %v510_v34, %v401_v33 }
  0xdd   : > { %v1036_v35 = vpop.f32.mrf.mxu0  ;;  %v1048_v36 = vpop.f32.mrf.mxu1 }
  0xde   : > { %v532_v60 = vadd.f32 %v1048_v36, %v1036_v35 }
  0xdf   : > { %v414_v37 = vpop.f32.mrf.mxu0  ;;  %v523_v38 = vpop.f32.mrf.mxu1 }
  0xe0   : > { %v524_v3 = vadd.f32 %v523_v38, %v414_v37 }
  0xe1   : > { %v1037_v39 = vpop.f32.mrf.mxu0  ;;  %v1049_v40 = vpop.f32.mrf.mxu1 }
  0xe2   : > { %v535_v10 = vadd.f32 %v1049_v40, %v1037_v39 }
  0xe3   : > { %v417_v41 = vpop.f32.mrf.mxu0  ;;  %v526_v43 = vpop.f32.mrf.mxu1 }
  0xe4   : > { %v527_v17 = vadd.f32 %v526_v43, %v417_v41 }
  0xe5   : > { %v1056_v44 = vpop.f32.mrf.mxu0  ;;  %v1066_v48 = vpop.f32.mrf.mxu1 }
  0xe6   : > { %v666_v47 = vadd.f32 %v1056_v44, %v516_v42 }
  0xe7   : > { %v633_v49 = vpop.f32.mrf.mxu0  ;;  %v767_v53 = vpop.f32.mrf.mxu1 }
  0xe8   : > { %v681_v51 = vadd.f32 %v990_v45, %v666_v47  ;;  %v664_v52 = vadd.f32 %v633_v49, %v508_v46 }
  0xe9   : > { %v1057_v54 = vpop.f32.mrf.mxu0  ;;  %v1067_v59 = vpop.f32.mrf.mxu1 }
  0xea   : > { %v800_v56 = vadd.f32 %v1066_v48, %v681_v51  ;;  %v679_v57 = vadd.f32 %v990_v45, %v664_v52  ;;  %v667_v58 = vadd.f32 %v1057_v54, %v519_v50 }
  0xeb   : > { %v636_v61 = vpop.f32.mrf.mxu0  ;;  %v770_v2 = vpop.f32.mrf.mxu1 }
  0xec   : > { %v808_v62 = vmax.f32 %v800_v56, 0.0  ;;  %v798_v63 = vadd.f32 %v767_v53, %v679_v57  ;;  %v682_v0 = vadd.f32 %v990_v45, %v667_v58  ;;  %v665_v1 = vadd.f32 %v636_v61, %v511_v55 }
  0xed   : > { %v1060_v4 = vpop.f32.mrf.mxu0  ;;  %v1070_v9 = vpop.f32.mrf.mxu1 }
  0xee   : > { %817 = vst.msk [vmem:[%s1277_s28 + $0x10] sm:$0xff] %vm814_vm4, %v808_v62  ;;  %v806_v5 = vmax.f32 %v798_v63, 0.0  ;;  %v801_v6 = vadd.f32 %v1067_v59, %v682_v0  ;;  %v680_v7 = vadd.f32 %v990_v45, %v665_v1  ;;  %v670_v8 = vadd.f32 %v1060_v4, %v532_v60 }
  0xef   : > { %v649_v11 = vpop.f32.mrf.mxu0  ;;  %v783_v16 = vpop.f32.mrf.mxu1 }
  0xf0   : > { %815 = vst.msk [vmem:[%s1277_s28] sm:$0xff] %vm814_vm4, %v806_v5  ;;  %v809_v12 = vmax.f32 %v801_v6, 0.0  ;;  %v799_v13 = vadd.f32 %v770_v2, %v680_v7  ;;  %v685_v14 = vadd.f32 %v990_v45, %v670_v8  ;;  %v668_v15 = vadd.f32 %v649_v11, %v524_v3 }
  0xf1   : > { %v1061_v18 = vpop.f32.mrf.mxu0  ;;  %v1071_v23 = vpop.f32.mrf.mxu1 }
  0xf2   : > { %818 = vst.msk [vmem:[%s1277_s28 + $0x18] sm:$0xff] %vm814_vm4, %v809_v12  ;;  %v807_v19 = vmax.f32 %v799_v13, 0.0  ;;  %v804_v20 = vadd.f32 %v1070_v9, %v685_v14  ;;  %v683_v21 = vadd.f32 %v990_v45, %v668_v15  ;;  %v671_v22 = vadd.f32 %v1061_v18, %v535_v10 }
  0xf3   : > { %v652_v24 = vpop.f32.mrf.mxu0  ;;  %v786_v32 = vpop.f32.mrf.mxu1 }
  0xf4   : > { %816 = vst.msk [vmem:[%s1277_s28 + $0x8] sm:$0xff] %vm814_vm4, %v807_v19  ;;  %v812_v25 = vmax.f32 %v804_v20, 0.0  ;;  %v802_v26 = vadd.f32 %v783_v16, %v683_v21  ;;  %v686_v27 = vadd.f32 %v990_v45, %v671_v22  ;;  %v669_v28 = vadd.f32 %v652_v24, %v527_v17 }
  0xf6   : > { %821 = vst.msk [vmem:[%s1277_s28 + $0x30] sm:$0xff] %vm814_vm4, %v812_v25  ;;  %v810_v29 = vmax.f32 %v802_v26, 0.0  ;;  %v805_v30 = vadd.f32 %v1071_v23, %v686_v27  ;;  %v684_v31 = vadd.f32 %v990_v45, %v669_v28 }
  0xf8   : > { %819 = vst.msk [vmem:[%s1277_s28 + $0x20] sm:$0xff] %vm814_vm4, %v810_v29  ;;  %v813_v33 = vmax.f32 %v805_v30, 0.0  ;;  %v803_v34 = vadd.f32 %v786_v32, %v684_v31 }
  0xfa   : > { %822 = vst.msk [vmem:[%s1277_s28 + $0x38] sm:$0xff] %vm814_vm4, %v813_v33  ;;  %v811_v35 = vmax.f32 %v803_v34, 0.0 }
  0xfc   : > { %820 = vst.msk [vmem:[%s1277_s28 + $0x28] sm:$0xff] %vm814_vm4, %v811_v35 }
  0xfd PF: > { %s15_s20 = sadd.s32 1, %s1145_s20   ;;  %s1310_s18 = smov %s1141_s19 }
  0xfe   : > { %p12_p5 = scmp.ge.s32.totalorder %s15_s20, 4   ;;  %s1311_s19 = smov %s1313_s21 }
 0x100   :  { %14 = sbr.rel (!%p12_p5) target bundleno = 2 (0x2), region = 78 }

</bundles_post_ra>
